<compile_context>
chip_gen: v7x
topology: tpu7x:2x2x1
jax: 0.10.0
libtpu: 0.0.40
codegen_flags: <defaults>
</compile_context>

<pallas_src>
import jax
import jax.numpy as jnp
from jax.experimental import pallas as pl
from jax.experimental.pallas import tpu as pltpu


def _round_up(x: int, m: int) -> int:
    return (x + m - 1) // m * m


def _t_tiling(t_len: int, block_t: int):
    """Triangle-axis padding / tile size (both multiples of 128, T_pad % TK == 0)."""
    block_t = _round_up(max(block_t, 128), 128)
    t128 = _round_up(max(t_len, 1), 128)
    tk = min(block_t, t128)
    t_pad = _round_up(t128, tk)
    return t_pad, tk


def _b_tiling(b_len: int, block_b: int):
    block_b = _round_up(max(block_b, 128), 128)
    b128 = _round_up(max(b_len, 1), 128)
    tb = min(block_b, b128)
    b_pad = _round_up(b128, tb)
    return b_pad, tb


# ---------------------------------------------------------------------------
# Per-mesh precompute (run ONCE per mesh, cache the result).
# ---------------------------------------------------------------------------
def build_area_emitter_table(is_emitter, emitter_idx, radiance, *, block_t: int = 1024):
    """rad_table[:, t] = radiance[emitter_idx[t]] if is_emitter[t] else 0.

    Returns a (3, T_pad) float32 table, T_pad a multiple of the triangle tile.
    """
    T = is_emitter.shape[0]
    t_pad, _ = _t_tiling(T, block_t)
    safe_e = jnp.where(is_emitter, emitter_idx, 0).astype(jnp.int32)
    rad_tri = jnp.where(is_emitter[:, None],
                        radiance[safe_e].astype(jnp.float32), 0.0)        # (T, 3)
    rad_table = jnp.zeros((3, t_pad), jnp.float32).at[:, :T].set(rad_tri.T)
    return rad_table


# ---------------------------------------------------------------------------
# Kernel: per (B-tile, T-tile) one-hot select, accumulated into the resident
# output block (at most one triangle chunk matches each query -> exact sum).
# ---------------------------------------------------------------------------
def _area_emitter_kernel(tri_ref, rad_ref, out_ref):
    k = pl.program_id(1)

    @pl.when(k == 0)
    def _():
        out_ref[...] = jnp.zeros_like(out_ref)

    tri = tri_ref[...]                      # (1, TB) int32, -1 = miss / padding
    rad = rad_ref[...]                      # (3, TK) f32, zero rows for non-emitters
    tk = rad.shape[1]

    # Local one-hot mask (TK, TB): column b selects row (tri[b] - k*TK) of this
    # chunk.  tri == -1 or tri outside this chunk matches nothing -> zero column,
    # so misses / padded lanes / non-chunk triangles need no extra masking.
    iota_k = jax.lax.broadcasted_iota(jnp.int32, (tk, 1), 0) + k * tk      # (TK, 1)
    mask = (tri == iota_k).astype(jnp.float32)                             # (TK, TB)

    # (3, TK) @ (TK, TB) -> (3, TB) on the MXU, f32 accumulate into resident out.
    out_ref[...] += jnp.dot(rad, mask, preferred_element_type=jnp.float32)


# ---------------------------------------------------------------------------
# Hot-path forward: triangle_idx + cached radiance table -> Le.
# ---------------------------------------------------------------------------
def area_emitter_forward(triangle_idx, rad_table, *,
                         block_b: int = 1024, block_t: int = 1024,
                         lane_major_output: bool = False):
    """triangle_idx: (B,) int32 (-1 = miss); rad_table: (3, T_pad) f32 from
    build_area_emitter_table.  Returns Le (B, 3) f32 (or (3, B) if
    lane_major_output=True, avoiding the final relayout)."""
    B = triangle_idx.shape[0]
    assert rad_table.ndim == 2 and rad_table.shape[0] == 3
    assert rad_table.dtype == jnp.float32
    t_pad = rad_table.shape[1]
    assert t_pad % 128 == 0, "rad_table must come from build_area_emitter_table"

    block_t = _round_up(max(block_t, 128), 128)
    tk = min(block_t, t_pad)
    assert t_pad % tk == 0, "block_t must match the block_t used to build the table"

    b_pad, tb = _b_tiling(B, block_b)
    assert tb % 128 == 0 and tk % 128 == 0

    grid = (b_pad // tb, t_pad // tk)

    # Lane-dense indices: B on the 128-lane axis.
    tri_pad = jnp.full((1, b_pad), -1, jnp.int32)
    tri_pad = tri_pad.at[0, :B].set(triangle_idx.astype(jnp.int32))

    # --- VMEM budget (bytes), same tiles fit v5e/v6e/v7x ---------------------
    mask_bytes = tk * tb * 4                       # f32 one-hot chunk (+ compare temp)
    tri_bytes = 2 * 8 * tb * 4                     # (1,TB) i32, sublane-padded, x2 buf
    rad_bytes = 2 * 8 * tk * 4                     # (3,TK) f32, sublane-padded, x2 buf
    out_bytes = 8 * tb * 4                         # resident (3,TB) f32 output block
    est = 2 * mask_bytes + tri_bytes + rad_bytes + out_bytes
    vmem_limit = int(min(max(2 * est, 32 * 1024 * 1024), 48 * 1024 * 1024))

    cost = pl.CostEstimate(
        flops=2 * 3 * b_pad * t_pad,
        transcendentals=0,
        bytes_accessed=b_pad * 4                      # indices
        + (b_pad // tb) * 3 * t_pad * 4               # table re-streamed per B tile
        + 3 * b_pad * 4,                              # output
    )

    out_t = pl.pallas_call(
        _area_emitter_kernel,
        out_shape=jax.ShapeDtypeStruct((3, b_pad), jnp.float32),
        grid=grid,
        in_specs=[
            # indices: tiled over B, constant across k (fetched once per B tile)
            pl.BlockSpec((1, tb), lambda i, k: (0, i)),
            # radiance table: pipelined over the triangle axis
            pl.BlockSpec((3, tk), lambda i, k: (0, k)),
        ],
        # output block resident across k (accumulator), lane-dense stores
        out_specs=pl.BlockSpec((3, tb), lambda i, k: (0, i)),
        compiler_params=pltpu.CompilerParams(
            dimension_semantics=("parallel", "arbitrary"),
            vmem_limit_bytes=vmem_limit,
        ),
        cost_estimate=cost,
    )(tri_pad, rad_table)

    if lane_major_output:
        return out_t[:, :B]          # (3, B), skips the relayout pass
    return out_t[:, :B].T            # (B, 3), matches the PyTorch module


# ---------------------------------------------------------------------------
# Pure-JAX reference (mirrors the PyTorch forward).
# ---------------------------------------------------------------------------
def _reference_forward(triangle_idx, is_emitter, emitter_idx, radiance):
    vis = triangle_idx != -1
    safe_tri = jnp.where(vis, triangle_idx, 0)
    is_area = is_emitter[safe_tri] & vis
    e = jnp.where(is_area, emitter_idx[safe_tri], 0)
    Le = jnp.where(is_area[:, None], radiance[e], 0.0)
    return Le.astype(jnp.float32)


if __name__ == "__main__":
    key = jax.random.PRNGKey(0)
    k_rad, k_tri, k_rad2, k_tri2 = jax.random.split(key, 4)

    # ---- test 1: tiny shapes, single-tile grid -----------------------------
    B, T = 8, 16
    is_emitter = (jnp.arange(T) % 3 == 0)
    K = int(is_emitter.sum())
    emitter_idx = jnp.where(is_emitter,
                            jnp.cumsum(is_emitter.astype(jnp.int32)) - 1,
                            -1).astype(jnp.int32)
    radiance = jax.random.uniform(k_rad, (K, 3), dtype=jnp.float32) * 10.0
    triangle_idx = jax.random.randint(k_tri, (B,), -1, T, dtype=jnp.int32)

    rad_table = build_area_emitter_table(is_emitter, emitter_idx, radiance)   # per-mesh, cached
    le = jax.block_until_ready(area_emitter_forward(triangle_idx, rad_table))

    le_ref = _reference_forward(triangle_idx, is_emitter, emitter_idx, radiance)
    assert le.shape == (B, 3)
    # All-f32 one-hot select -> exact vs. reference.
    assert jnp.allclose(le, le_ref, rtol=1e-6, atol=1e-6), (le, le_ref)
    # zero rows (miss / non-emitter) must be exactly zero
    assert jnp.all((le_ref != 0).any(-1) | (le == 0).all(-1))

    # ---- test 2: multi-tile grid over B and T (padding + accumulator path) --
    B2, T2 = 300, 300
    is_emitter2 = (jnp.arange(T2) % 7 == 0)
    K2 = int(is_emitter2.sum())
    emitter_idx2 = jnp.where(is_emitter2,
                             jnp.cumsum(is_emitter2.astype(jnp.int32)) - 1,
                             -1).astype(jnp.int32)
    radiance2 = jax.random.uniform(k_rad2, (K2, 3), dtype=jnp.float32) * 5.0
    triangle_idx2 = jax.random.randint(k_tri2, (B2,), -1, T2, dtype=jnp.int32)

    rad_table2 = build_area_emitter_table(is_emitter2, emitter_idx2, radiance2,
                                          block_t=128)
    le2 = jax.block_until_ready(
        area_emitter_forward(triangle_idx2, rad_table2, block_b=128, block_t=128))
    le2_ref = _reference_forward(triangle_idx2, is_emitter2, emitter_idx2, radiance2)
    assert le2.shape == (B2, 3)
    assert jnp.allclose(le2, le2_ref, rtol=1e-6, atol=1e-6)

    print("KERNEL_OK")
</pallas_src>

<mosaic_0001>
module attributes {stable_mosaic.version = 11 : i64} {
  func.func @_area_emitter_kernel(%arg0: i32, %arg1: i32, %arg2: memref<1x128xi32, #tpu.memory_space<vmem>>, %arg3: memref<3x128xf32, #tpu.memory_space<vmem>>, %arg4: memref<3x128xf32, #tpu.memory_space<vmem>>) attributes {dimension_semantics = [#tpu.dimension_semantics<parallel>, #tpu.dimension_semantics<arbitrary>], iteration_bounds = array<i64: 1, 1>, scalar_prefetch = 0 : i64, scratch_operands = 0 : i64, tpu.core_type = #tpu.core_type<tc>, window_params = [{transform_indices = @transform_0, window_bounds = array<i64: 1, 128>}, {transform_indices = @transform_1, window_bounds = array<i64: 3, 128>}, {transform_indices = @transform_2, window_bounds = array<i64: 3, 128>}]} {
    %c0_i32 = arith.constant 0 : i32
    %0 = arith.cmpi eq, %arg1, %c0_i32 : i32
    %1 = arith.extui %0 : i1 to i32
    %c0_i32_0 = arith.constant 0 : i32
    %2 = arith.cmpi ne, %1, %c0_i32_0 : i32
    scf.if %2 {
      %cst_8 = arith.constant 0.000000e+00 : f32
      %18 = vector.broadcast %cst_8 : f32 to vector<3x128xf32>
      %c0_9 = arith.constant 0 : index
      %c0_10 = arith.constant 0 : index
      %19 = vector.load %arg4[%c0_9, %c0_10] : memref<3x128xf32, #tpu.memory_space<vmem>>, vector<3x128xf32>
      tpu.vector_store %arg4[%c0_9, %c0_10], %18 {strides = array<i32>} : memref<3x128xf32, #tpu.memory_space<vmem>>, vector<3x128xf32>,
    } else {
    }
    %c0 = arith.constant 0 : index
    %c0_1 = arith.constant 0 : index
    %3 = vector.load %arg2[%c0, %c0_1] : memref<1x128xi32, #tpu.memory_space<vmem>>, vector<1x128xi32>
    %c0_2 = arith.constant 0 : index
    %c0_3 = arith.constant 0 : index
    %4 = vector.load %arg3[%c0_2, %c0_3] : memref<3x128xf32, #tpu.memory_space<vmem>>, vector<3x128xf32>
    %5 = tpu.iota {dimensions = array<i32: 0>} : vector<128x1xi32>
    %c128_i32 = arith.constant 128 : i32
    %6 = arith.muli %arg1, %c128_i32 : i32
    %7 = vector.broadcast %6 : i32 to vector<128x1xi32>
    %8 = arith.addi %5, %7 : vector<128x1xi32>
    %9 = vector.broadcast %3 : vector<1x128xi32> to vector<128x128xi32>
    %10 = vector.broadcast %8 : vector<128x1xi32> to vector<128x128xi32>
    %11 = arith.cmpi eq, %9, %10 : vector<128x128xi32>
    %12 = arith.extui %11 : vector<128x128xi1> to vector<128x128xi32>
    %13 = arith.sitofp %12 : vector<128x128xi32> to vector<128x128xf32>
    %c0_4 = arith.constant 0 : index
    %c0_5 = arith.constant 0 : index
    %14 = vector.load %arg4[%c0_4, %c0_5] : memref<3x128xf32, #tpu.memory_space<vmem>>, vector<3x128xf32>
    %cst = arith.constant dense<0.000000e+00> : vector<3x128xf32>
    %15 = tpu.matmul %4, %13, %cst {dimension_numbers = #tpu.dot_dimension_numbers<[1], [0], [0], [1], [0, 0, 1, 1], [], []>} : vector<3x128xf32>, vector<128x128xf32>, vector<3x128xf32> -> vector<3x128xf32>
    %16 = arith.addf %14, %15 : vector<3x128xf32>
    %c0_6 = arith.constant 0 : index
    %c0_7 = arith.constant 0 : index
    %17 = vector.load %arg4[%c0_6, %c0_7] : memref<3x128xf32, #tpu.memory_space<vmem>>, vector<3x128xf32>
    tpu.vector_store %arg4[%c0_6, %c0_7], %16 {strides = array<i32>} : memref<3x128xf32, #tpu.memory_space<vmem>>, vector<3x128xf32>,
    return
  }
  func.func @transform_0(%arg0: i32, %arg1: i32) -> (i32, i32) {
    %c0_i32 = arith.constant 0 : i32
    %c0_i32_0 = arith.constant 0 : i32
    return %c0_i32, %arg0 : i32, i32
  }
  func.func @transform_1(%arg0: i32, %arg1: i32) -> (i32, i32) {
    %c0_i32 = arith.constant 0 : i32
    %c0_i32_0 = arith.constant 0 : i32
    return %c0_i32, %arg1 : i32, i32
  }
  func.func @transform_2(%arg0: i32, %arg1: i32) -> (i32, i32) {
    %c0_i32 = arith.constant 0 : i32
    %c0_i32_0 = arith.constant 0 : i32
    return %c0_i32, %arg0 : i32, i32
  }
}

</mosaic_0001>

<bundles_post_ra>
// kernel: tpu_custom_call.1
= control target key start
LH: loop header
LB: loop body
LE: loop exit
PB: predicated region body
PF: predicated region fallthrough
CT: control target
= control target key end

     0   :  { %7 = vsyncpa [#allocation3], 0  ;;  %s465_s0 = inlined_call_operand.hbm [shape: s32[1,128], index: 0, kind: input, shape index: {}]   ;;  %s466_s1 = inlined_call_operand.hbm [shape: f32[3,128], index: 1, kind: input, shape index: {}]   ;;  %s467_s2 = inlined_call_operand.hbm [shape: f32[3,128], index: 2, kind: output, shape index: {}]  }
   0x1   :  { %8 = vsyncpa [#allocation6], 0 }
   0x2   :  { %9 = vsyncpa [#allocation4], 0  ;;  %s407_s9 = smov [#allocation2]   ;;  %s408_s11 = smov [#allocation5]  }
   0x3   :  { %s16_s10 = sshll.u32 %s407_s9, 4  ;;  %s26_s12 = sshll.u32 %s408_s11, 4  ;;  %s17_s10 = int_to_ptr.vmem [resolvable:$true] %s16_s10  ;;  %s27_s12 = int_to_ptr.vmem [resolvable:$true] %s26_s12 }
   0x4   :  { %s335_s15 = scalar_lea.hbm %s465_s0, 16 }
   0x5   :  { %p336_p0 = scmp.ne.s32.totalorder %s465_s0, %s335_s15  ;;  %p339_p1 = scmp.lt.u32.totalorder %s335_s15, %s465_s0 }
   0x7   :  { %p341_p2 = pnand %p339_p1, %p336_p0 }
   0x9   :  { %344 = shalt.err (!%p341_p2)
}
   0xa   :  { %s345_s20 = scalar_lea.vmem %s17_s10, 16  ;;  %s349_s21 = scalar_lea.vmem %s17_s10, 32 }
   0xb   :  { %p346_p3 = scmp.ne.s32.totalorder %s17_s10, %s345_s20  ;;  %p350_p4 = scmp.lt.s32.totalorder %s17_s10, %s17_s10 }
   0xc   :  { %p351_p5 = scmp.lt.s32.totalorder %s349_s21, %s345_s20 }
   0xe   :  { %p352_p6 = por %p351_p5, %p350_p4 }
  0x10   :  { %p353_p7 = pnand %p352_p6, %p346_p3 }
  0x12   :  { %356 = shalt.err (!%p353_p7)
}
  0x13   :  { %19 = dma.hbm_to_vmem [thread:$0]  %s465_s0, 16, %s17_s10, [#allocation3]  }
  0x14   :  { %s357_s26 = scalar_lea.hbm %s466_s1, 64 }
  0x15   :  { %p358_p8 = scmp.ne.s32.totalorder %s466_s1, %s357_s26  ;;  %p361_p9 = scmp.lt.u32.totalorder %s357_s26, %s466_s1 }
  0x17   :  { %p363_p10 = pnand %p361_p9, %p358_p8 }
  0x19   :  { %366 = shalt.err (!%p363_p10)
}
  0x1a   :  { %s367_s3 = scalar_lea.vmem %s27_s12, 64  ;;  %p372_p12 = scmp.lt.s32.totalorder %s27_s12, %s27_s12 }
  0x1b   :  { %p368_p11 = scmp.ne.s32.totalorder %s27_s12, %s367_s3  ;;  %p373_p13 = scmp.lt.s32.totalorder %s367_s3, %s367_s3 }
  0x1d   :  { %p374_p0 = por %p373_p13, %p372_p12 }
  0x1f   :  { %p375_p1 = pnand %p374_p0, %p368_p11 }
  0x21   :  { %378 = shalt.err (!%p375_p1)
}
  0x22   :  { %29 = dma.hbm_to_vmem [thread:$0]  %s466_s1, 64, %s27_s12, [#allocation6]  }
  0x23   :  { %401 = dma.done.wait [#allocation3], 16  }
  0x24   :  { %402 = vsyncadd [#allocation3], 4294967280 }
  0x25   :  { %403 = dma.done.wait [#allocation6], 64  }
  0x26   :  { %404 = vsyncadd [#allocation6], 4294967232  ;;  %v43_v0 = vlaneseq  ;;  %v409_v1 = vmov 0.0|0.0   ;;  %v410_v2 = vmov 0.0   ;;  %vm411_vm0 = vmmov 0   ;;  %s413_s1 = smov [#allocation7]  }
  0x27   :  { %304 = vmatprep.subr.bf16.mxu0 %v409_v1  ;;  %40 = vst [vmem:[#allocation7] sm:$0x7] %v410_v2  ;;  %301 = vmatprep.mubr.msk.f32.mxu0 %vm411_vm0, %v410_v2  ;;  %v219_v7 = vld [vmem:[#allocation2] ss:$0 sm:$0xff]  ;;  %v412_v10 = vmov 1.0|1.0  }
  0x28   :  { %v44_v3 = vshrl.u32 %v43_v0, 7  ;;  %v42_v21 = vld [vmem:[#allocation5] sm:$0x7]  ;;  %s209_s5 = sshll.u32 %s413_s1, 4  ;;  %s210_s5 = int_to_ptr.vmem [resolvable:$true] %s209_s5 }
  0x29   :  { %s379_s6 = scalar_lea.vmem %s210_s5, 64  ;;  %p384_p3 = scmp.lt.s32.totalorder %s210_s5, %s210_s5 }
  0x2a   :  { %v45_v4 = vadd.s32 8, %v44_v3  ;;  %v46_v5 = vadd.s32 16, %v44_v3  ;;  %v47_v6 = vadd.s32 24, %v44_v3  ;;  %v48_v8 = vadd.s32 32, %v44_v3  ;;  %p380_p2 = scmp.ne.s32.totalorder %s210_s5, %s379_s6  ;;  %p385_p4 = scmp.lt.s32.totalorder %s379_s6, %s379_s6 }
  0x2b   :  { %v49_v9 = vadd.s32 40, %v44_v3  ;;  %vm82_vm1 = vcmp.eq.s32.totalorder %v219_v7, %v44_v3  ;;  %v50_v11 = vadd.s32 48, %v44_v3  ;;  %v51_v12 = vadd.s32 56, %v44_v3 }
  0x2c   :  { %vm83_vm2 = vcmp.eq.s32.totalorder %v219_v7, %v45_v4  ;;  %vm84_vm3 = vcmp.eq.s32.totalorder %v219_v7, %v46_v5  ;;  %vm85_vm4 = vcmp.eq.s32.totalorder %v219_v7, %v47_v6  ;;  %vm86_vm7 = vcmp.eq.s32.totalorder %v219_v7, %v48_v8  ;;  %p386_p5 = por %p385_p4, %p384_p3 }
  0x2d   :  { %vm305_vm5 = vmpackc.low %vm83_vm2, %vm82_vm1  ;;  %vm87_vm8 = vcmp.eq.s32.totalorder %v219_v7, %v49_v9  ;;  %vm88_vm10 = vcmp.eq.s32.totalorder %v219_v7, %v50_v11  ;;  %vm89_vm11 = vcmp.eq.s32.totalorder %v219_v7, %v51_v12  ;;  %v52_v13 = vadd.s32 64, %v44_v3 }
  0x2e   :  { %306 = vmatpush3.bf16.msk.msra.mxu0 %vm305_vm5, %v412_v10  ;;  %vm308_vm6 = vmpackc.low %vm85_vm4, %vm84_vm3  ;;  %v53_v14 = vadd.s32 72, %v44_v3  ;;  %v54_v15 = vadd.s32 80, %v44_v3  ;;  %v55_v16 = vadd.s32 88, %v44_v3  ;;  %v56_v17 = vadd.s32 96, %v44_v3  ;;  %v130_v22 = vld [vmem:[#allocation7] sm:$0x7]  ;;  %p387_p6 = pnand %p386_p5, %p380_p2 }
  0x2f   :  { %307 = vmatprep.subr.bf16.mxu0 %v409_v1  ;;  %vm311_vm9 = vmpackc.low %vm87_vm8, %vm86_vm7  ;;  %vm90_vm13 = vcmp.eq.s32.totalorder %v219_v7, %v52_v13  ;;  %v57_v18 = vadd.s32 104, %v44_v3  ;;  %v58_v19 = vadd.s32 112, %v44_v3  ;;  %v59_v20 = vadd.s32 120, %v44_v3 }
  0x30   :  { %vm314_vm12 = vmpackc.low %vm89_vm11, %vm88_vm10  ;;  %vm91_vm14 = vcmp.eq.s32.totalorder %v219_v7, %v53_v14  ;;  %vm92_vm0 = vcmp.eq.s32.totalorder %v219_v7, %v54_v15  ;;  %vm93_vm1 = vcmp.eq.s32.totalorder %v219_v7, %v55_v16  ;;  %vm94_vm3 = vcmp.eq.s32.totalorder %v219_v7, %v56_v17 }
  0x31   :  { %vm317_vm15 = vmpackc.low %vm91_vm14, %vm90_vm13  ;;  %vm95_vm4 = vcmp.eq.s32.totalorder %v219_v7, %v57_v18  ;;  %vm97_vm7 = vcmp.eq.s32.totalorder %v219_v7, %v59_v20 }
  0x32   :  { %309 = vmatpush3.bf16.msk.msra.mxu0 %vm308_vm6, %v412_v10  ;;  %vm320_vm2 = vmpackc.low %vm93_vm1, %vm92_vm0  ;;  %vm96_vm6 = vcmp.eq.s32.totalorder %v219_v7, %v58_v19 }
  0x33   :  { %310 = vmatprep.subr.bf16.mxu0 %v409_v1  ;;  %vm323_vm5 = vmpackc.low %vm95_vm4, %vm94_vm3 }
  0x34   :  { %vm326_vm8 = vmpackc.low %vm97_vm7, %vm96_vm6 }
  0x36   :  { %312 = vmatpush3.bf16.msk.msra.mxu0 %vm311_vm9, %v412_v10 }
  0x37   :  { %313 = vmatprep.subr.bf16.mxu0 %v409_v1 }
  0x3a   :  { %315 = vmatpush3.bf16.msk.msra.mxu0 %vm314_vm12, %v412_v10 }
  0x3b   :  { %316 = vmatprep.subr.bf16.mxu0 %v409_v1 }
  0x3e   :  { %318 = vmatpush3.bf16.msk.msra.mxu0 %vm317_vm15, %v412_v10 }
  0x3f   :  { %319 = vmatprep.subr.bf16.mxu0 %v409_v1 }
  0x42   :  { %321 = vmatpush3.bf16.msk.msra.mxu0 %vm320_vm2, %v412_v10 }
  0x43   :  { %322 = vmatprep.subr.bf16.mxu0 %v409_v1 }
  0x46   :  { %324 = vmatpush3.bf16.msk.msra.mxu0 %vm323_vm5, %v412_v10 }
  0x47   :  { %325 = vmatprep.subr.bf16.mxu0 %v409_v1 }
  0x4a   :  { %327 = vmatpush3.bf16.msk.msra.mxu0 %vm326_vm8, %v412_v10 }
  0x4d   :  { %302 = vmatmul.mubr.f32.vlgmr.msra.gmra.mrb[0].mxu0 %v42_v21 }
 0x120   :  { %v197_v23 = vpop.f32.mrb[0].mxu0 }
 0x121   :  { %v201_v24 = vadd.f32 %v197_v23, %v130_v22  ;;  %v303_v25 = vpop.f32.mrb[1].mxu0 }
 0x123   :  { %202 = vst [vmem:[#allocation7] sm:$0x7] %v201_v24 }
 0x124   :  { %390 = shalt.err (!%p387_p6)
}
 0x125   :  { %s391_s9 = scalar_lea.hbm %s467_s2, 64 }
 0x126   :  { %p392_p7 = scmp.ne.s32.totalorder %s467_s2, %s391_s9  ;;  %p395_p8 = scmp.lt.u32.totalorder %s391_s9, %s467_s2 }
 0x128   :  { %p397_p9 = pnand %p395_p8, %p392_p7 }
 0x12a   :  { %400 = shalt.err (!%p397_p9)
}
 0x12b   :  { %212 = dma.vmem_to_hbm [thread:$0]  %s210_s5, 64, %s467_s2, [#allocation4]  }
 0x12c   :  { %405 = dma.done.wait [#allocation4], 64  }
 0x12d   :  { %406 = vsyncadd [#allocation4], 4294967232 }
 0x12e   :  { %216 = vsyncpa [#allocation3], 1 }
 0x12f   :  { %217 = vsyncpa [#allocation6], 1 }
 0x130   :  { %218 = vsyncpa [#allocation4], 1 }

</bundles_post_ra>
